<compile_context>
chip_gen: v6e
topology: v6e:2x2x1
jax: 0.10.0
libtpu: 0.0.40
codegen_flags: <defaults>
</compile_context>

<pallas_src>
import functools

import jax
import jax.numpy as jnp
from jax import lax
from jax.experimental import pallas as pl
from jax.experimental.pallas import tpu as pltpu


# ----------------------------------------------------------------------------
# Fused Pallas kernel: entire SAGE forward pass
# ----------------------------------------------------------------------------
def _sage_forward_kernel(*refs, num_layers):
    """refs = (x, adj, w_cat[0], b[0], ..., w_cat[L-1], b[L-1], out).

    x:     (N, F0p)        f32, feature dim padded to a multiple of 128
    adj:   (N, N)          bf16 {0,1}, adj[i, j] = 1  <=>  edge j -> i
    w_cat: (2*Fip, Fop)    bf16, concat([W_l, W_r], axis=0), zero-padded
    b:     (1, Fop)        f32, zero-padded
    out:   (N, Fop_last)   f32
    """
    x_ref, adj_ref = refs[0], refs[1]
    layer_refs = refs[2:2 + 2 * num_layers]
    o_ref = refs[2 + 2 * num_layers]

    n = x_ref.shape[0]
    adj_bf = adj_ref[...]                                    # (N, N) bf16 {0,1}

    # Mean-aggregation row scale: 1 / max(deg, 1).  Degree via MXU matvec with
    # f32 accumulation (exact for {0,1}) -- no O(N^2) f32 temporary, no XLU
    # lane-reduce over N^2 elements.  Reciprocal on the EUP.
    ones_col = jnp.ones((n, 1), dtype=jnp.bfloat16)
    deg = jnp.dot(adj_bf, ones_col, preferred_element_type=jnp.float32)  # (N,1)
    inv_deg = pl.reciprocal(jnp.maximum(deg, 1.0), approx=False)

    h = x_ref[...].astype(jnp.float32)
    for li in range(num_layers):                 # num_layers is small & static
        w_cat = layer_refs[2 * li][...]          # (2*Fip, Fop) bf16
        b = layer_refs[2 * li + 1][...]          # (1, Fop)     f32

        h_bf = h.astype(jnp.bfloat16)

        # neighbor mean:  (adj @ h) * inv_deg            (MXU, f32 accumulate)
        agg = jnp.dot(adj_bf, h_bf, preferred_element_type=jnp.float32) * inv_deg

        # fused SAGEConv:  [agg | h] @ [W_l ; W_r] + b   (one MXU matmul, 2x K)
        cat = jnp.concatenate([agg.astype(jnp.bfloat16), h_bf], axis=1)
        out = jnp.dot(cat, w_cat, preferred_element_type=jnp.float32) + b

        if li != num_layers - 1:                            # ReLU (not on last)
            out = jnp.maximum(out, 0.0)

        # PairNorm, mode 'PN-SI', scale = 1 (matches the module's PairNorm)
        col_mean = jnp.sum(out, axis=0, keepdims=True) * (1.0 / n)
        out = out - col_mean
        out = out * lax.rsqrt(1e-6 + jnp.sum(out * out, axis=1, keepdims=True))
        h = out

    # final sigmoid (exact reciprocal); single full-width lane-dense store
    o_ref[...] = pl.reciprocal(1.0 + jnp.exp(-h), approx=False).astype(o_ref.dtype)


# ----------------------------------------------------------------------------
# Wrapper
# ----------------------------------------------------------------------------
def _round_up(v, m=128):
    return ((v + m - 1) // m) * m


def _padded_bytes(shape, dtype):
    """Approximate VMEM bytes of a 2-D array under (sublane, 128)-lane tiling."""
    itemsize = jnp.dtype(dtype).itemsize
    sublane = {4: 8, 2: 16, 1: 32}.get(itemsize, 8)
    r = shape[0] if len(shape) >= 2 else 1
    c = shape[-1]
    return _round_up(r, sublane) * _round_up(c, 128) * itemsize


def sage_forward(params, x, adj):
    """params: list of dicts {'w_l': (Fi,Fo) f32, 'w_r': (Fi,Fo) f32, 'b': (1,Fo) f32}."""
    n, f_in = x.shape
    num_layers = len(params)
    num_class = params[-1]['w_l'].shape[1]

    # ---- pad feature dims to multiples of 128 (lane width); exact by zero pad
    f_in_p = _round_up(f_in)
    x_p = jnp.zeros((n, f_in_p), jnp.float32).at[:, :f_in].set(x.astype(jnp.float32))

    flat = []
    prev_p, prev_d = f_in_p, f_in
    out_p_last = f_in_p
    for p in params:
        in_d, out_d = p['w_l'].shape
        assert in_d == prev_d, (in_d, prev_d)
        out_p = _round_up(out_d)
        wl = jnp.zeros((prev_p, out_p), jnp.float32).at[:in_d, :out_d].set(
            p['w_l'].astype(jnp.float32))
        wr = jnp.zeros((prev_p, out_p), jnp.float32).at[:in_d, :out_d].set(
            p['w_r'].astype(jnp.float32))
        w_cat = jnp.concatenate([wl, wr], axis=0).astype(jnp.bfloat16)  # (2*Fip, Fop)
        b = jnp.zeros((1, out_p), jnp.float32).at[:, :out_d].set(
            p['b'].astype(jnp.float32))
        flat += [w_cat, b]
        prev_p, prev_d = out_p, out_d
        out_p_last = out_p

    # adj should arrive in bf16 already ({0,1} exact); only cast if wider.
    adj_bf = adj if adj.dtype == jnp.bfloat16 else adj.astype(jnp.bfloat16)

    # ---- per-call VMEM budget derived from the actual resident footprint ----
    max_f_p = max([f_in_p] + [_round_up(p['w_l'].shape[1]) for p in params])
    est = _padded_bytes((n, n), jnp.bfloat16)            # adj (the O(N^2) object)
    est += _padded_bytes((n, f_in_p), jnp.float32)       # x
    for a in flat:
        est += _padded_bytes(a.shape, a.dtype)           # weights + biases
    est += 6 * _padded_bytes((n, max_f_p), jnp.float32)  # h/agg/cat/out temporaries
    est += _padded_bytes((n, out_p_last), jnp.float32)   # output buffer
    # floor 16 MiB (<= default on every generation), cap 48 MiB (headroom on
    # v7x's 64 MiB physical VMEM).  Beyond that, use the row-tiled path (TODO).
    vmem_limit = int(min(max(2 * est, 16 * 2 ** 20), 48 * 2 ** 20))

    vmem = pl.BlockSpec(memory_space=pltpu.MemorySpace.VMEM)
    kernel = functools.partial(_sage_forward_kernel, num_layers=num_layers)
    out_padded = pl.pallas_call(
        kernel,
        out_shape=jax.ShapeDtypeStruct((n, out_p_last), jnp.float32),
        in_specs=[vmem] * (2 + 2 * num_layers),
        out_specs=vmem,
        compiler_params=pltpu.CompilerParams(vmem_limit_bytes=vmem_limit),
    )(x_p, adj_bf, *flat)

    return out_padded[:, :num_class]


def init_params(key, input_dim, hidden, num_layers, num_class):
    dims = [(input_dim, hidden)]
    for _ in range(num_layers - 2):
        dims.append((hidden, hidden))
    dims.append((hidden, num_class))
    params = []
    for in_d, out_d in dims:
        key, kl, kr, kb = jax.random.split(key, 4)
        limit = (6.0 / (in_d + out_d)) ** 0.5
        params.append(dict(
            w_l=jax.random.uniform(kl, (in_d, out_d), jnp.float32, -limit, limit),
            w_r=jax.random.uniform(kr, (in_d, out_d), jnp.float32, -limit, limit),
            b=jax.random.uniform(kb, (1, out_d), jnp.float32, -0.1, 0.1),
        ))
    return params


# ----------------------------------------------------------------------------
# Pure-JAX reference (f32, highest precision) for correctness check
# ----------------------------------------------------------------------------
def _sage_layer_ref(x, w_l, w_r, b, adj):
    deg = jnp.sum(adj, axis=1, keepdims=True)
    agg = jnp.dot(adj, x, precision='highest') / jnp.maximum(deg, 1.0)
    return (jnp.dot(agg, w_l, precision='highest')
            + jnp.dot(x, w_r, precision='highest') + b)


def _pairnorm_ref(x):
    x = x - jnp.mean(x, axis=0)
    return x / jnp.sqrt(1e-6 + jnp.sum(x * x, axis=1, keepdims=True))


def forward_ref(params, x, adj):
    num_layers = len(params)
    h = x
    for i, p in enumerate(params):
        h = _sage_layer_ref(h, p['w_l'], p['w_r'], p['b'], adj)
        if i != num_layers - 1:
            h = jnp.maximum(h, 0.0)
        h = _pairnorm_ref(h)
    return jax.nn.sigmoid(h)


# ----------------------------------------------------------------------------
if __name__ == "__main__":
    key = jax.random.PRNGKey(0)
    N, F_IN, HIDDEN, NUM_LAYERS, NUM_CLASS = 32, 64, 32, 3, 7

    k_x, k_adj, k_p = jax.random.split(key, 3)
    x_feature = jax.random.normal(k_x, (N, F_IN), dtype=jnp.float32)

    # random sparse-ish symmetric adjacency, no self-loops (SAGE uses the root
    # weight W_r for the node's own features)
    adj_rand = (jax.random.uniform(k_adj, (N, N)) < 0.2).astype(jnp.float32)
    adj = jnp.maximum(adj_rand, adj_rand.T) * (1.0 - jnp.eye(N, dtype=jnp.float32))
    # store adjacency narrow at the source ({0,1} is exact in bf16) so the
    # kernel call does not trigger a separate O(N^2) conversion pass
    adj_bf16 = adj.astype(jnp.bfloat16)

    params = init_params(k_p, F_IN, HIDDEN, NUM_LAYERS, NUM_CLASS)

    out = jax.block_until_ready(sage_forward(params, x_feature, adj_bf16))

    assert out.shape == (N, NUM_CLASS), out.shape
    assert bool(jnp.all(jnp.isfinite(out)))

    ref = jax.block_until_ready(forward_ref(params, x_feature, adj))
    assert bool(jnp.allclose(out, ref, atol=2e-2, rtol=2e-2)), (
        float(jnp.max(jnp.abs(out - ref))))

    print("KERNEL_OK")
</pallas_src>

<mosaic_0001>
module attributes {stable_mosaic.version = 11 : i64} {
  func.func @_sage_forward_kernel(%arg0: memref<32x128xf32, #tpu.memory_space<vmem>>, %arg1: memref<32x32xbf16, #tpu.memory_space<vmem>>, %arg2: memref<256x128xbf16, #tpu.memory_space<vmem>>, %arg3: memref<1x128xf32, #tpu.memory_space<vmem>>, %arg4: memref<256x128xbf16, #tpu.memory_space<vmem>>, %arg5: memref<1x128xf32, #tpu.memory_space<vmem>>, %arg6: memref<256x128xbf16, #tpu.memory_space<vmem>>, %arg7: memref<1x128xf32, #tpu.memory_space<vmem>>, %arg8: memref<32x128xf32, #tpu.memory_space<vmem>>) attributes {dimension_semantics = [], scalar_prefetch = 0 : i64, scratch_operands = 0 : i64, tpu.core_type = #tpu.core_type<tc>} {
    %c0 = arith.constant 0 : index
    %c0_0 = arith.constant 0 : index
    %0 = vector.load %arg1[%c0, %c0_0] : memref<32x32xbf16, #tpu.memory_space<vmem>>, vector<32x32xbf16>
    %cst = arith.constant 1.000000e+00 : bf16
    %1 = vector.broadcast %cst : bf16 to vector<32x1xbf16>
    %cst_1 = arith.constant dense<0.000000e+00> : vector<32x1xf32>
    %2 = tpu.matmul %0, %1, %cst_1 {dimension_numbers = #tpu.dot_dimension_numbers<[1], [0], [0], [1], [0, 0, 1, 1], [], []>} : vector<32x32xbf16>, vector<32x1xbf16>, vector<32x1xf32> -> vector<32x1xf32>
    %cst_2 = arith.constant 1.000000e+00 : f32
    %3 = vector.broadcast %cst_2 : f32 to vector<32x1xf32>
    %4 = arith.maximumf %2, %3 : vector<32x1xf32>
    %5 = tpu.reciprocal %4 : vector<32x1xf32> -> vector<32x1xf32>
    %c0_3 = arith.constant 0 : index
    %c0_4 = arith.constant 0 : index
    %6 = vector.load %arg0[%c0_3, %c0_4] : memref<32x128xf32, #tpu.memory_space<vmem>>, vector<32x128xf32>
    %c0_5 = arith.constant 0 : index
    %c0_6 = arith.constant 0 : index
    %7 = vector.load %arg2[%c0_5, %c0_6] : memref<256x128xbf16, #tpu.memory_space<vmem>>, vector<256x128xbf16>
    %c0_7 = arith.constant 0 : index
    %c0_8 = arith.constant 0 : index
    %8 = vector.load %arg3[%c0_7, %c0_8] : memref<1x128xf32, #tpu.memory_space<vmem>>, vector<1x128xf32>
    %9 = arith.truncf %6 : vector<32x128xf32> to vector<32x128xbf16>
    %cst_9 = arith.constant dense<0.000000e+00> : vector<32x128xf32>
    %10 = tpu.matmul %0, %9, %cst_9 {dimension_numbers = #tpu.dot_dimension_numbers<[1], [0], [0], [1], [0, 0, 1, 1], [], []>} : vector<32x32xbf16>, vector<32x128xbf16>, vector<32x128xf32> -> vector<32x128xf32>
    %11 = vector.broadcast %5 : vector<32x1xf32> to vector<32x128xf32>
    %12 = arith.mulf %10, %11 : vector<32x128xf32>
    %13 = arith.truncf %12 : vector<32x128xf32> to vector<32x128xbf16>
    %14 = tpu.concatenate %13, %9 in 1 : vector<32x128xbf16>, vector<32x128xbf16> -> vector<32x256xbf16>
    %cst_10 = arith.constant dense<0.000000e+00> : vector<32x128xf32>
    %15 = tpu.matmul %14, %7, %cst_10 {dimension_numbers = #tpu.dot_dimension_numbers<[1], [0], [0], [1], [0, 0, 1, 1], [], []>} : vector<32x256xbf16>, vector<256x128xbf16>, vector<32x128xf32> -> vector<32x128xf32>
    %16 = vector.broadcast %8 : vector<1x128xf32> to vector<32x128xf32>
    %17 = arith.addf %15, %16 : vector<32x128xf32>
    %cst_11 = arith.constant 0.000000e+00 : f32
    %18 = vector.broadcast %cst_11 : f32 to vector<32x128xf32>
    %19 = arith.maximumf %17, %18 : vector<32x128xf32>
    %cst_12 = arith.constant dense<0.000000e+00> : vector<128xf32>
    %20 = vector.multi_reduction <add>, %19, %cst_12 [0] : vector<32x128xf32> to vector<128xf32>
    %21 = vector.shape_cast %20 : vector<128xf32> to vector<1x128xf32>
    %cst_13 = arith.constant 3.125000e-02 : f32
    %22 = vector.broadcast %cst_13 : f32 to vector<1x128xf32>
    %23 = arith.mulf %21, %22 : vector<1x128xf32>
    %24 = vector.broadcast %23 : vector<1x128xf32> to vector<32x128xf32>
    %25 = arith.subf %19, %24 : vector<32x128xf32>
    %26 = arith.mulf %25, %25 : vector<32x128xf32>
    %cst_14 = arith.constant dense<0.000000e+00> : vector<32xf32>
    %27 = vector.multi_reduction <add>, %26, %cst_14 [1] : vector<32x128xf32> to vector<32xf32>
    %28 = vector.shape_cast %27 : vector<32xf32> to vector<32x1xf32>
    %cst_15 = arith.constant 9.99999997E-7 : f32
    %29 = vector.broadcast %cst_15 : f32 to vector<32x1xf32>
    %30 = arith.addf %29, %28 : vector<32x1xf32>
    %31 = math.rsqrt %30 : vector<32x1xf32>
    %32 = vector.broadcast %31 : vector<32x1xf32> to vector<32x128xf32>
    %33 = arith.mulf %25, %32 : vector<32x128xf32>
    %c0_16 = arith.constant 0 : index
    %c0_17 = arith.constant 0 : index
    %34 = vector.load %arg4[%c0_16, %c0_17] : memref<256x128xbf16, #tpu.memory_space<vmem>>, vector<256x128xbf16>
    %c0_18 = arith.constant 0 : index
    %c0_19 = arith.constant 0 : index
    %35 = vector.load %arg5[%c0_18, %c0_19] : memref<1x128xf32, #tpu.memory_space<vmem>>, vector<1x128xf32>
    %36 = arith.truncf %33 : vector<32x128xf32> to vector<32x128xbf16>
    %cst_20 = arith.constant dense<0.000000e+00> : vector<32x128xf32>
    %37 = tpu.matmul %0, %36, %cst_20 {dimension_numbers = #tpu.dot_dimension_numbers<[1], [0], [0], [1], [0, 0, 1, 1], [], []>} : vector<32x32xbf16>, vector<32x128xbf16>, vector<32x128xf32> -> vector<32x128xf32>
    %38 = vector.broadcast %5 : vector<32x1xf32> to vector<32x128xf32>
    %39 = arith.mulf %37, %38 : vector<32x128xf32>
    %40 = arith.truncf %39 : vector<32x128xf32> to vector<32x128xbf16>
    %41 = tpu.concatenate %40, %36 in 1 : vector<32x128xbf16>, vector<32x128xbf16> -> vector<32x256xbf16>
    %cst_21 = arith.constant dense<0.000000e+00> : vector<32x128xf32>
    %42 = tpu.matmul %41, %34, %cst_21 {dimension_numbers = #tpu.dot_dimension_numbers<[1], [0], [0], [1], [0, 0, 1, 1], [], []>} : vector<32x256xbf16>, vector<256x128xbf16>, vector<32x128xf32> -> vector<32x128xf32>
    %43 = vector.broadcast %35 : vector<1x128xf32> to vector<32x128xf32>
    %44 = arith.addf %42, %43 : vector<32x128xf32>
    %cst_22 = arith.constant 0.000000e+00 : f32
    %45 = vector.broadcast %cst_22 : f32 to vector<32x128xf32>
    %46 = arith.maximumf %44, %45 : vector<32x128xf32>
    %cst_23 = arith.constant dense<0.000000e+00> : vector<128xf32>
    %47 = vector.multi_reduction <add>, %46, %cst_23 [0] : vector<32x128xf32> to vector<128xf32>
    %48 = vector.shape_cast %47 : vector<128xf32> to vector<1x128xf32>
    %cst_24 = arith.constant 3.125000e-02 : f32
    %49 = vector.broadcast %cst_24 : f32 to vector<1x128xf32>
    %50 = arith.mulf %48, %49 : vector<1x128xf32>
    %51 = vector.broadcast %50 : vector<1x128xf32> to vector<32x128xf32>
    %52 = arith.subf %46, %51 : vector<32x128xf32>
    %53 = arith.mulf %52, %52 : vector<32x128xf32>
    %cst_25 = arith.constant dense<0.000000e+00> : vector<32xf32>
    %54 = vector.multi_reduction <add>, %53, %cst_25 [1] : vector<32x128xf32> to vector<32xf32>
    %55 = vector.shape_cast %54 : vector<32xf32> to vector<32x1xf32>
    %cst_26 = arith.constant 9.99999997E-7 : f32
    %56 = vector.broadcast %cst_26 : f32 to vector<32x1xf32>
    %57 = arith.addf %56, %55 : vector<32x1xf32>
    %58 = math.rsqrt %57 : vector<32x1xf32>
    %59 = vector.broadcast %58 : vector<32x1xf32> to vector<32x128xf32>
    %60 = arith.mulf %52, %59 : vector<32x128xf32>
    %c0_27 = arith.constant 0 : index
    %c0_28 = arith.constant 0 : index
    %61 = vector.load %arg6[%c0_27, %c0_28] : memref<256x128xbf16, #tpu.memory_space<vmem>>, vector<256x128xbf16>
    %c0_29 = arith.constant 0 : index
    %c0_30 = arith.constant 0 : index
    %62 = vector.load %arg7[%c0_29, %c0_30] : memref<1x128xf32, #tpu.memory_space<vmem>>, vector<1x128xf32>
    %63 = arith.truncf %60 : vector<32x128xf32> to vector<32x128xbf16>
    %cst_31 = arith.constant dense<0.000000e+00> : vector<32x128xf32>
    %64 = tpu.matmul %0, %63, %cst_31 {dimension_numbers = #tpu.dot_dimension_numbers<[1], [0], [0], [1], [0, 0, 1, 1], [], []>} : vector<32x32xbf16>, vector<32x128xbf16>, vector<32x128xf32> -> vector<32x128xf32>
    %65 = vector.broadcast %5 : vector<32x1xf32> to vector<32x128xf32>
    %66 = arith.mulf %64, %65 : vector<32x128xf32>
    %67 = arith.truncf %66 : vector<32x128xf32> to vector<32x128xbf16>
    %68 = tpu.concatenate %67, %63 in 1 : vector<32x128xbf16>, vector<32x128xbf16> -> vector<32x256xbf16>
    %cst_32 = arith.constant dense<0.000000e+00> : vector<32x128xf32>
    %69 = tpu.matmul %68, %61, %cst_32 {dimension_numbers = #tpu.dot_dimension_numbers<[1], [0], [0], [1], [0, 0, 1, 1], [], []>} : vector<32x256xbf16>, vector<256x128xbf16>, vector<32x128xf32> -> vector<32x128xf32>
    %70 = vector.broadcast %62 : vector<1x128xf32> to vector<32x128xf32>
    %71 = arith.addf %69, %70 : vector<32x128xf32>
    %cst_33 = arith.constant dense<0.000000e+00> : vector<128xf32>
    %72 = vector.multi_reduction <add>, %71, %cst_33 [0] : vector<32x128xf32> to vector<128xf32>
    %73 = vector.shape_cast %72 : vector<128xf32> to vector<1x128xf32>
    %cst_34 = arith.constant 3.125000e-02 : f32
    %74 = vector.broadcast %cst_34 : f32 to vector<1x128xf32>
    %75 = arith.mulf %73, %74 : vector<1x128xf32>
    %76 = vector.broadcast %75 : vector<1x128xf32> to vector<32x128xf32>
    %77 = arith.subf %71, %76 : vector<32x128xf32>
    %78 = arith.mulf %77, %77 : vector<32x128xf32>
    %cst_35 = arith.constant dense<0.000000e+00> : vector<32xf32>
    %79 = vector.multi_reduction <add>, %78, %cst_35 [1] : vector<32x128xf32> to vector<32xf32>
    %80 = vector.shape_cast %79 : vector<32xf32> to vector<32x1xf32>
    %cst_36 = arith.constant 9.99999997E-7 : f32
    %81 = vector.broadcast %cst_36 : f32 to vector<32x1xf32>
    %82 = arith.addf %81, %80 : vector<32x1xf32>
    %83 = math.rsqrt %82 : vector<32x1xf32>
    %84 = vector.broadcast %83 : vector<32x1xf32> to vector<32x128xf32>
    %85 = arith.mulf %77, %84 : vector<32x128xf32>
    %cst_37 = arith.constant 0.000000e+00 : f32
    %86 = vector.broadcast %cst_37 : f32 to vector<32x128xf32>
    %87 = arith.subf %86, %85 : vector<32x128xf32>
    %88 = math.exp %87 : vector<32x128xf32>
    %cst_38 = arith.constant 1.000000e+00 : f32
    %89 = vector.broadcast %cst_38 : f32 to vector<32x128xf32>
    %90 = arith.addf %89, %88 : vector<32x128xf32>
    %91 = tpu.reciprocal %90 : vector<32x128xf32> -> vector<32x128xf32>
    %c0_39 = arith.constant 0 : index
    %c0_40 = arith.constant 0 : index
    %92 = vector.load %arg8[%c0_39, %c0_40] : memref<32x128xf32, #tpu.memory_space<vmem>>, vector<32x128xf32>
    tpu.vector_store %arg8[%c0_39, %c0_40], %91 {strides = array<i32>} : memref<32x128xf32, #tpu.memory_space<vmem>>, vector<32x128xf32>,
    return
  }
}

</mosaic_0001>

<bundles_post_ra>
// kernel: tpu_custom_call.1
= control target key start
LH: loop header
LB: loop body
LE: loop exit
PB: predicated region body
PF: predicated region fallthrough
CT: control target
= control target key end

     0   :  { %13 = vsyncpa [#allocation3], 0  ;;  %s1670_s0 = inlined_call_operand.hbm [shape: f32[32,128], index: 0, kind: input, shape index: {}]   ;;  %s1671_s1 = inlined_call_operand.hbm [shape: bf16[32,32], index: 1, kind: input, shape index: {}]   ;;  %s1672_s2 = inlined_call_operand.hbm [shape: bf16[256,128], index: 2, kind: input, shape index: {}]   ;;  %s1673_s3 = inlined_call_operand.vmem [shape: f32[1,128], index: 3, kind: input, shape index: {}]   ;;  %s1674_s4 = inlined_call_operand.hbm [shape: bf16[256,128], index: 4, kind: input, shape index: {}]   ;;  %s1675_s5 = inlined_call_operand.vmem [shape: f32[1,128], index: 5, kind: input, shape index: {}]   ;;  %s1676_s6 = inlined_call_operand.hbm [shape: bf16[256,128], index: 6, kind: input, shape index: {}]   ;;  %s1677_s7 = inlined_call_operand.vmem [shape: f32[1,128], index: 7, kind: input, shape index: {}]   ;;  %s1678_s8 = inlined_call_operand.hbm [shape: f32[32,128], index: 8, kind: output, shape index: {}]  }
   0x1   :  { %14 = vsyncpa [#allocation6], 0 }
   0x2   :  { %15 = vsyncpa [#allocation9], 0 }
   0x3   :  { %16 = vsyncpa [#allocation4], 0  ;;  %s1523_s27 = smov [#allocation5]  }
   0x4   :  { %s34_s28 = sshll.u32 %s1523_s27, 4  ;;  %s35_s28 = int_to_ptr.vmem [resolvable:$true] %s34_s28 }
   0x5   :  { %s1403_s29 = scalar_lea.vmem %s35_s28, 256  ;;  %p1408_p1 = scmp.lt.s32.totalorder %s35_s28, %s35_s28 }
   0x6   :  { %p1404_p0 = scmp.ne.s32.totalorder %s35_s28, %s1403_s29  ;;  %p1409_p2 = scmp.lt.s32.totalorder %s1403_s29, %s1403_s29 }
   0x8   :  { %p1410_p3 = por %p1409_p2, %p1408_p1 }
   0xa   :  { %p1411_p4 = pnand %p1410_p3, %p1404_p0 }
   0xc   :  { %1414 = shalt.err (!%p1411_p4)
}
   0xd   :  { %s1524_s30 = smov 64   ;;  %s1525_s9 = smov 4  }
   0xe   :  { %40 = dma.hbm_to_vmem [thread:$0]  %s1671_s1, 256, %s35_s28, [#allocation6], %s1524_s30, %s1524_s30, %s1525_s9  }
   0xf   :  { %s1526_s12 = smov [#allocation8]   ;;  %s1527_s14 = smov [#allocation2]  }
  0x10   :  { %s60_s13 = sshll.u32 %s1526_s12, 4  ;;  %s22_s15 = sshll.u32 %s1527_s14, 4  ;;  %s61_s13 = int_to_ptr.vmem [resolvable:$true] %s60_s13  ;;  %s23_s15 = int_to_ptr.vmem [resolvable:$true] %s22_s15 }
  0x11   :  { %s1423_s16 = scalar_lea.vmem %s61_s13, 2048  ;;  %p1428_p6 = scmp.lt.s32.totalorder %s61_s13, %s61_s13 }
  0x12   :  { %p1424_p5 = scmp.ne.s32.totalorder %s61_s13, %s1423_s16  ;;  %p1429_p7 = scmp.lt.s32.totalorder %s1423_s16, %s1423_s16 }
  0x14   :  { %p1430_p8 = por %p1429_p7, %p1428_p6 }
  0x16   :  { %p1431_p9 = pnand %p1430_p8, %p1424_p5 }
  0x18   :  { %1434 = shalt.err (!%p1431_p9)
}
  0x19   :  { %66 = dma.hbm_to_vmem [thread:$0]  %s1674_s4, 2048, %s61_s13, [#allocation9], %s1524_s30, %s1524_s30, %s1525_s9  }
  0x1a   :  { %s1443_s1 = scalar_lea.vmem %s23_s15, 512  ;;  %p1448_p11 = scmp.lt.s32.totalorder %s23_s15, %s23_s15 }
  0x1b   :  { %p1444_p10 = scmp.ne.s32.totalorder %s23_s15, %s1443_s1  ;;  %p1449_p12 = scmp.lt.s32.totalorder %s1443_s1, %s1443_s1 }
  0x1d   :  { %p1450_p13 = por %p1449_p12, %p1448_p11 }
  0x1f   :  { %p1451_p0 = pnand %p1450_p13, %p1444_p10 }
  0x21   :  { %1454 = shalt.err (!%p1451_p0)
}
  0x22   :  { %s1528_s19 = smov 128   ;;  %s1529_s20 = smov 8  }
  0x23   :  { %28 = dma.hbm_to_vmem [thread:$0]  %s1670_s0, 512, %s23_s15, [#allocation3], %s1528_s19, %s1528_s19, %s1529_s20  }
  0x24   :  { %s1530_s23 = smov [#allocation7]   ;;  %s1531_s4 = smov [#allocation10]  }
  0x25   :  { %s46_s24 = sshll.u32 %s1530_s23, 4  ;;  %s74_s25 = sshll.u32 %s1531_s4, 4  ;;  %s47_s24 = int_to_ptr.vmem [resolvable:$true] %s46_s24  ;;  %s75_s25 = int_to_ptr.vmem [resolvable:$true] %s74_s25 }
  0x26   :  { %s1463_s26 = scalar_lea.vmem %s47_s24, 2048  ;;  %p1468_p2 = scmp.lt.s32.totalorder %s47_s24, %s47_s24 }
  0x27   :  { %p1464_p1 = scmp.ne.s32.totalorder %s47_s24, %s1463_s26  ;;  %p1469_p3 = scmp.lt.s32.totalorder %s1463_s26, %s1463_s26 }
  0x29   :  { %p1470_p4 = por %p1469_p3, %p1468_p2 }
  0x2b   :  { %p1471_p5 = pnand %p1470_p4, %p1464_p1 }
  0x2d   :  { %1474 = shalt.err (!%p1471_p5)
}
  0x2e   :  { %52 = dma.hbm_to_vmem [thread:$0]  %s1672_s2, 2048, %s47_s24, [#allocation6], %s1524_s30, %s1524_s30, %s1525_s9  }
  0x2f   :  { %s1483_s0 = scalar_lea.vmem %s75_s25, 2048  ;;  %p1488_p7 = scmp.lt.s32.totalorder %s75_s25, %s75_s25 }
  0x30   :  { %p1484_p6 = scmp.ne.s32.totalorder %s75_s25, %s1483_s0  ;;  %p1489_p8 = scmp.lt.s32.totalorder %s1483_s0, %s1483_s0 }
  0x32   :  { %p1490_p9 = por %p1489_p8, %p1488_p7 }
  0x34   :  { %p1491_p10 = pnand %p1490_p9, %p1484_p6 }
  0x36   :  { %1494 = shalt.err (!%p1491_p10)
}
  0x37   :  { %80 = dma.hbm_to_vmem [thread:$0]  %s1676_s6, 2048, %s75_s25, [#allocation9], %s1524_s30, %s1524_s30, %s1525_s9  }
  0x38   :  { %1515 = dma.done.wait [#allocation3], 512  }
  0x39   :  { %1516 = vsyncadd [#allocation3], 4294966784 }
  0x3a   :  { %1517 = dma.done.wait [#allocation6], 2304  }
  0x3b   :  { %1518 = vsyncadd [#allocation6], 4294964992 }
  0x3c   :  { %1519 = dma.done.wait [#allocation9], 4096  }
  0x3d   :  { %1520 = vsyncadd [#allocation9], 4294963200  ;;  %v1532_v0 = vmov 1065369472   ;;  %vm114_vm0 = vcmask 261120   ;;  %v1610_v1 = vld [vmem:[#allocation5] sm:$0xff]  }
  0x3e   :  { %1251 = vmatprep.subr.bf16.mxu0 %v1532_v0  ;;  %v1612_v2 = vld [vmem:[#allocation5 + $0x8] sm:$0xff]   ;;  %1255 = vmatprep.mubr.msk.bf16.mxu0 %vm114_vm0, %v1610_v1  ;;  %v180_v3 = vld [vmem:[#allocation2 + $0x10] sm:$0xff]  ;;  %v181_v4 = vld [vmem:[#allocation2 + $0x18] sm:$0xff]  ;;  %v1533_v9 = vmov 0  }
  0x3f   :  { %1252 = vmatpush3.bf16.msra.mxu0 %v1532_v0  ;;  %v178_v5 = vld [vmem:[#allocation2] sm:$0xff]  ;;  %v1618_v6 = vpack.c.bf16 %v181_v4, %v180_v3  ;;  %v179_v7 = vld [vmem:[#allocation2 + $0x8] sm:$0xff]  ;;  %1296 = vset.pattern.permute.xlu1 %v1533_v9  ;;  %v1303_v14 = vld [vmem:[#allocation7 + $0x68] sm:$0xff]  }
  0x40   :  { %1253 = vmatprep.subr.bf16.mxu0 %v1532_v0  ;;  %v215_v8 = vpack.c.bf16 %v179_v7, %v178_v5  ;;  %1295 = vset.pattern.permute.xlu0 %v1533_v9  ;;  %v1299_v10 = vld [vmem:[#allocation7 + $0x78] sm:$0xff]   ;;  %v1301_v12 = vld [vmem:[#allocation7 + $0x70] sm:$0xff]   ;;  %v1304_v15 = vld [vmem:[#allocation7 + $0x28] sm:$0xff]  }
  0x41   :  { %v1300_v11 = vld [vmem:[#allocation7 + $0x38] sm:$0xff]   ;;  %v1302_v13 = vld [vmem:[#allocation7 + $0x30] sm:$0xff]   ;;  %v1305_v16 = vld [vmem:[#allocation7 + $0x60] sm:$0xff]  }
  0x42   :  { %v1306_v17 = vld [vmem:[#allocation7 + $0x20] sm:$0xff]   ;;  %v1307_v18 = vld [vmem:[#allocation7 + $0x58] sm:$0xff]   ;;  %v1309_v20 = vld [vmem:[#allocation7 + $0x50] sm:$0xff]  }
  0x43   :  { %1254 = vmatpush3.bf16.msra.mxu0 %v1532_v0  ;;  %v1308_v19 = vld [vmem:[#allocation7 + $0x18] sm:$0xff]   ;;  %v1310_v21 = vld [vmem:[#allocation7 + $0x10] sm:$0xff]   ;;  %v1311_v30 = vld [vmem:[#allocation7 + $0x48] sm:$0xff]  }
  0x44   :  { %1259 = vmatprep.subr.bf16.mxu0 %v1618_v6  ;;  %v1312_v31 = vld [vmem:[#allocation7 + $0x8] sm:$0xff]   ;;  %v1313_v33 = vld [vmem:[#allocation7 + $0x40] sm:$0xff]   ;;  %v1096_v58 = vld [vmem:[%s1673_s3] ss:$0 sm:$0xff] }
  0x45   :  { %v1314_v35 = vld [vmem:[#allocation7] sm:$0xff]  }
  0x46   :  { %1256 = vmatmul.mubr.msk.bf16.vlgmr.msra.gmra.mxu0 %vm114_vm0, %v1612_v2 }
  0x47   :  { %1263 = vmatprep.mubr.msk.bf16.mxu0 %vm114_vm0, %v1610_v1  ;;  %1260 = vmatpush3.bf16.msra.mxu0 %v1618_v6 }
  0x48   :  { %1261 = vmatprep.subr.bf16.mxu0 %v215_v8 }
  0x4b   :  { %1262 = vmatpush3.bf16.msra.mxu0 %v215_v8 }
  0x4c   :  { %1159 = vmatprep.subr.bf16.mxu0 %v1299_v10 }
  0x4e   :  { %1264 = vmatmul.mubr.msk.bf16.vlgmr.msra.gmra.mxu0 %vm114_vm0, %v1612_v2 }
  0x4f   :  { %426 = vmatprep.mubr.bf16.mxu0 %v215_v8  ;;  %1160 = vmatpush3.bf16.msra.mxu0 %v1300_v11 }
  0x50   :  { %1161 = vmatprep.subr.bf16.mxu0 %v1301_v12 }
  0x53   :  { %1162 = vmatpush3.bf16.msra.mxu0 %v1302_v13 }
  0x54   :  { %1163 = vmatprep.subr.bf16.mxu0 %v1303_v14 }
  0x57   :  { %1164 = vmatpush3.bf16.msra.mxu0 %v1304_v15 }
  0x58   :  { %1165 = vmatprep.subr.bf16.mxu0 %v1305_v16 }
  0x5b   :  { %1166 = vmatpush3.bf16.msra.mxu0 %v1306_v17 }
  0x5c   :  { %1167 = vmatprep.subr.bf16.mxu0 %v1307_v18 }
  0x5f   :  { %1168 = vmatpush3.bf16.msra.mxu0 %v1308_v19 }
  0x60   :  { %1169 = vmatprep.subr.bf16.mxu0 %v1309_v20 }
  0x63   :  { %1170 = vmatpush3.bf16.msra.mxu0 %v1310_v21 }
  0x64   :  { %1171 = vmatprep.subr.bf16.mxu0 %v1311_v30  ;;  %v1316_v30 = vld [vmem:[#allocation8 + $0x38] sm:$0xff]  }
  0x67   :  { %1172 = vmatpush3.bf16.msra.mxu0 %v1312_v31  ;;  %v1317_v31 = vld [vmem:[#allocation8 + $0x70] sm:$0xff]  }
  0x68   :  { %1173 = vmatprep.subr.bf16.mxu0 %v1313_v33  ;;  %v1319_v33 = vld [vmem:[#allocation8 + $0x68] sm:$0xff]  }
  0x6b   :  { %1174 = vmatpush3.bf16.msra.mxu0 %v1314_v35  ;;  %v1321_v35 = vld [vmem:[#allocation8 + $0x60] sm:$0xff]  }
 0x106   :  { %v1257_v22 = vpop.f32.mrf.mxu0 }
 0x107   :  { %v172_v23 = vmax.f32 %v1257_v22, 1.0 }
 0x108   :  { %v155_v24 = vpop.f32.mrf.mxu0 }
 0x109   :  { %1347 = vrcp.f32 %v172_v23  ;;  %v170_v25 = vmax.f32 %v155_v24, 1.0 }
 0x10a   :  { %v1258_v26 = vpop.f32.mrf.mxu0 }
 0x10b   :  { %1349 = vrcp.f32 %v170_v25  ;;  %v173_v27 = vmax.f32 %v1258_v26, 1.0 }
 0x10c   :  { %v158_v28 = vpop.f32.mrf.mxu0 }
 0x10d   :  { %1351 = vrcp.f32 %v173_v27  ;;  %v171_v29 = vmax.f32 %v158_v28, 1.0 }
 0x10e   :  { %v1265_v38 = vpop.f32.mrf.mxu0 }
 0x10f   :  { %1353 = vrcp.f32 %v171_v29  ;;  %v1315_v29 = vld [vmem:[#allocation8 + $0x78] sm:$0xff]  }
 0x110   :  { %v251_v39 = vpop.f32.mrf.mxu0  ;;  %1191 = vmatprep.subr.bf16.mxu1 %v1315_v29 }
 0x111   :  { %1192 = vmatpush3.bf16.msra.mxu1 %v1316_v30 }
 0x112   :  { %v1266_v40 = vpop.f32.mrf.mxu0  ;;  %1193 = vmatprep.subr.bf16.mxu1 %v1317_v31 }
 0x114   :  { %v254_v43 = vpop.f32.mrf.mxu0 }
 0x116   :  { %v1348_v32 = vpop.eup %1347 }
 0x117   :  { %278 = vperm.xlu1 %1296, %v1348_v32   ;;  %v1318_v32 = vld [vmem:[#allocation8 + $0x30] sm:$0xff]  }
 0x118   :  { %v1350_v34 = vpop.eup %1349  ;;  %1194 = vmatpush3.bf16.msra.mxu1 %v1318_v32 }
 0x119   :  { %268 = vperm.xlu0 %1295, %v1350_v34   ;;  %v1320_v34 = vld [vmem:[#allocation8 + $0x28] sm:$0xff]   ;;  %1195 = vmatprep.subr.bf16.mxu1 %v1319_v33 }
 0x11a   :  { %v1352_v36 = vpop.eup %1351 }
 0x11b   :  { %283 = vperm.xlu1 %1296, %v1352_v36   ;;  %v1322_v36 = vld [vmem:[#allocation8 + $0x20] sm:$0xff]  }
 0x11c   :  { %v1354_v37 = vpop.eup %1353  ;;  %1196 = vmatpush3.bf16.msra.mxu1 %v1320_v34 }
 0x11d   :  { %273 = vperm.xlu0 %1295, %v1354_v37   ;;  %1197 = vmatprep.subr.bf16.mxu1 %v1321_v35  ;;  %v1323_v37 = vld [vmem:[#allocation8 + $0x58] sm:$0xff]  }
 0x120   :  { %1198 = vmatpush3.bf16.msra.mxu1 %v1322_v36 }
 0x121   :  { %1199 = vmatprep.subr.bf16.mxu1 %v1323_v37 }
 0x192   :  { %v1628_v42 = vpop.permute.xlu1 %278 }
 0x193   :  { %v288_v50 = vmul.f32 %v1265_v38, %v1628_v42  ;;  %v1324_v38 = vld [vmem:[#allocation8 + $0x18] sm:$0xff]  }
 0x194   :  { %v1626_v41 = vpop.permute.xlu0 %268  ;;  %1200 = vmatpush3.bf16.msra.mxu1 %v1324_v38 }
 0x195   :  { %v286_v45 = vmul.f32 %v1626_v41, %v251_v39  ;;  %v1325_v39 = vld [vmem:[#allocation8 + $0x50] sm:$0xff]  }
 0x196   :  { %v1634_v48 = vpop.permute.xlu1 %283  ;;  %1201 = vmatprep.subr.bf16.mxu1 %v1325_v39 }
 0x197   :  { %v289_v49 = vmul.f32 %v1266_v40, %v1634_v48 }
 0x198   :  { %v1630_v44 = vpop.permute.xlu0 %273 }
 0x199   :  { %v287_v46 = vmul.f32 %v1630_v44, %v254_v43  ;;  %v291_v51 = vpack.c.bf16 %v289_v49, %v288_v50 }
 0x19b   :  { %v290_v47 = vpack.c.bf16 %v287_v46, %v286_v45 }
 0x19d   :  { %427 = vmatmul.mubr.bf16.vlgmr.msra.gmra.mxu0 %v290_v47 }
 0x19e   :  { %434 = vmatprep.mubr.bf16.mxu0 %v1618_v6 }
 0x1a5   :  { %435 = vmatmul.mubr.bf16.gmra.mxu0 %v291_v51 }
 0x1a6   :  { %1271 = vmatprep.mubr.msk.bf16.mxu0 %vm114_vm0, %v1610_v1 }
 0x25d   :  { %v1175_v52 = vpop.f32.mrf.mxu0 }
 0x25f   :  { %v1176_v53 = vpop.f32.mrf.mxu0 }
 0x260   :  { %v1177_v56 = vadd.f32 %v1176_v53, %v1175_v52 }
 0x261   :  { %v1178_v54 = vpop.f32.mrf.mxu0 }
 0x262   :  { %v429_v62 = vadd.f32 %v1177_v56, %v1096_v58 }
 0x263   :  { %v1179_v55 = vpop.f32.mrf.mxu0 }
 0x264   :  { %v1180_v57 = vadd.f32 %v1179_v55, %v1178_v54  ;;  %v443_v6 = vmax.f32 %v429_v62, 0.0  ;;  %v1326_v62 = vld [vmem:[#allocation8 + $0x10] sm:$0xff]  }
 0x265   :  { %v1181_v59 = vpop.f32.mrf.mxu0  ;;  %1202 = vmatpush3.bf16.msra.mxu1 %v1326_v62  ;;  %v1336_v62 = vld [vmem:[#allocation10 + $0x28] sm:$0xff]  }
 0x266   :  { %v432_v60 = vadd.f32 %v1180_v57, %v1096_v58 }
 0x267   :  { %v1182_v61 = vpop.f32.mrf.mxu0 }
 0x268   :  { %v1183_v63 = vadd.f32 %v1182_v61, %v1181_v59  ;;  %v444_v3 = vmax.f32 %v432_v60, 0.0 }
 0x269   :  { %v1184_v0 = vpop.f32.mrf.mxu0 }
 0x26a   :  { %v437_v4 = vadd.f32 %v1183_v63, %v1096_v58  ;;  %v447_v9 = vadd.f32 %v444_v3, %v443_v6  ;;  %v1327_v63 = vld [vmem:[#allocation8 + $0x48] sm:$0xff]  }
 0x26b   :  { %v1185_v5 = vpop.f32.mrf.mxu0  ;;  %1203 = vmatprep.subr.bf16.mxu1 %v1327_v63  ;;  %v1337_v63 = vld [vmem:[#allocation10 + $0x60] sm:$0xff]  }
 0x26c   :  { %v445_v7 = vmax.f32 %v437_v4, 0.0  ;;  %v1186_v8 = vadd.f32 %v1185_v5, %v1184_v0  ;;  %v1328_v0 = vld [vmem:[#allocation8 + $0x8] sm:$0xff]   ;;  %v1330_v4 = vld [vmem:[#allocation8] sm:$0xff]  }
 0x26d   :  { %1204 = vmatpush3.bf16.msra.mxu1 %v1328_v0  ;;  %v1338_v0 = vld [vmem:[#allocation10 + $0x20] sm:$0xff]  }
 0x26e   :  { %v440_v10 = vadd.f32 %v1186_v8, %v1096_v58  ;;  %v448_v11 = vadd.f32 %v447_v9, %v445_v7 }
 0x270   :  { %v446_v12 = vmax.f32 %v440_v10, 0.0 }
 0x272   :  { %v449_v13 = vadd.f32 %v448_v11, %v446_v12 }
 0x274   :  { %v450_v14 = vrot.slane %v449_v13, 4 }
 0x276   :  { %v451_v15 = vadd.f32 %v450_v14, %v449_v13 }
 0x278   :  { %v452_v16 = vrot.slane %v451_v15, 2 }
 0x27a   :  { %v453_v17 = vadd.f32 %v452_v16, %v451_v15 }
 0x27c   :  { %v454_v18 = vrot.slane %v453_v17, 1 }
 0x27e   :  { %v455_v19 = vadd.f32 %v454_v18, %v453_v17 }
 0x280   :  { %v456_v20 = vmul.f32 0.03125, %v455_v19 }
 0x282   :  { %v460_v21 = vsub.f32 %v446_v12, %v456_v20  ;;  %v459_v22 = vsub.f32 %v445_v7, %v456_v20  ;;  %v457_v25 = vsub.f32 %v443_v6, %v456_v20  ;;  %v458_v27 = vsub.f32 %v444_v3, %v456_v20  ;;  %v1329_v3 = vld [vmem:[#allocation8 + $0x40] sm:$0xff]   ;;  %v1115_v20 = vld [vmem:[%s1675_s5] ss:$0 sm:$0xff] }
 0x283   :  { %1205 = vmatprep.subr.bf16.mxu1 %v1329_v3  ;;  %v1339_v3 = vld [vmem:[#allocation10 + $0x58] sm:$0xff]  }
 0x284   :  { %v464_v23 = vmul.f32 %v460_v21, %v460_v21  ;;  %v463_v24 = vmul.f32 %v459_v22, %v459_v22  ;;  %v461_v26 = vmul.f32 %v457_v25, %v457_v25  ;;  %v462_v28 = vmul.f32 %v458_v27, %v458_v27  ;;  %1206 = vmatpush3.bf16.msra.mxu1 %v1330_v4  ;;  %v1340_v4 = vld [vmem:[#allocation10 + $0x18] sm:$0xff]  }
 0x286   :  { %471 = vadd.xlane.f32.xlu1 %v464_v23  ;;  %469 = vadd.xlane.f32.xlu0 %v463_v24 }
 0x28a   :  { %465 = vadd.xlane.f32.xlu0 %v461_v26 }
 0x28e   :  { %467 = vadd.xlane.f32.xlu0 %v462_v28 }
 0x30f   :  { %v472_v40 = vpop.xlane.xlu1 %471  ;;  %v470_v43 = vpop.xlane.xlu0 %469 }
 0x310   :  { %v476_v45 = vadd.f32 1e-06, %v472_v40  ;;  %v475_v46 = vadd.f32 1e-06, %v470_v43 }
 0x312   :  { %1355 = vrsqrt.f32 %v476_v45 }
 0x313   :  { %1357 = vrsqrt.f32 %v475_v46  ;;  %v466_v47 = vpop.xlane.xlu0 %465 }
 0x314   :  { %v473_v49 = vadd.f32 1e-06, %v466_v47 }
 0x316   :  { %1359 = vrsqrt.f32 %v473_v49 }
 0x317   :  { %v468_v50 = vpop.xlane.xlu0 %467 }
 0x318   :  { %v474_v51 = vadd.f32 1e-06, %v468_v50 }
 0x31a   :  { %1361 = vrsqrt.f32 %v474_v51 }
 0x31f   :  { %v1356_v52 = vpop.eup %1355 }
 0x320   :  { %v1358_v53 = vpop.eup %1357  ;;  %v484_v54 = vmul.f32 %v1356_v52, %v460_v21 }
 0x321   :  { %v483_v55 = vmul.f32 %v1358_v53, %v459_v22 }
 0x323   :  { %v519_v56 = vpack.c.bf16 %v484_v54, %v483_v55  ;;  %v1360_v57 = vpop.eup %1359 }
 0x324   :  { %v481_v59 = vmul.f32 %v1360_v57, %v457_v25  ;;  %v1331_v57 = vld [vmem:[#allocation10 + $0x78] sm:$0xff]  }
 0x325   :  { %1267 = vmatprep.subr.bf16.mxu0 %v519_v56  ;;  %1223 = vmatprep.subr.bf16.mxu1 %v1331_v57 }
 0x326   :  { %1268 = vmatpush3.bf16.msra.mxu0 %v519_v56 }
 0x327   :  { %v1362_v58 = vpop.eup %1361 }
 0x328   :  { %v482_v60 = vmul.f32 %v1362_v58, %v458_v27  ;;  %v1332_v58 = vld [vmem:[#allocation10 + $0x38] sm:$0xff]  }
 0x32a   :  { %v518_v61 = vpack.c.bf16 %v482_v60, %v481_v59  ;;  %v1333_v59 = vld [vmem:[#allocation10 + $0x70] sm:$0xff]  }
 0x32b   :  { %v1334_v60 = vld [vmem:[#allocation10 + $0x30] sm:$0xff]  }
 0x32c   :  { %1269 = vmatprep.subr.bf16.mxu0 %v518_v61  ;;  %709 = vmatprep.mubr.bf16.mxu1 %v518_v61 }
 0x32d   :  { %1270 = vmatpush3.bf16.msra.mxu0 %v518_v61  ;;  %v1335_v61 = vld [vmem:[#allocation10 + $0x68] sm:$0xff]  }
 0x330   :  { %1272 = vmatmul.mubr.msk.bf16.vlgmr.msra.gmra.mxu0 %vm114_vm0, %v1612_v2 }
 0x331   :  { %1279 = vmatprep.mubr.msk.bf16.mxu0 %vm114_vm0, %v1610_v1 }
 0x3f0   :  { %v1273_v5 = vpop.f32.mrf.mxu0 }
 0x3f1   :  { %v571_v12 = vmul.f32 %v1273_v5, %v1628_v42  ;;  %v1341_v5 = vld [vmem:[#allocation10 + $0x50] sm:$0xff]  }
 0x3f2   :  { %v554_v6 = vpop.f32.mrf.mxu0 }
 0x3f3   :  { %v569_v9 = vmul.f32 %v554_v6, %v1626_v41 }
 0x3f4   :  { %v1274_v7 = vpop.f32.mrf.mxu0 }
 0x3f5   :  { %v572_v1 = vmul.f32 %v1274_v7, %v1634_v48 }
 0x3f6   :  { %v557_v8 = vpop.f32.mrf.mxu0 }
 0x3f7   :  { %v570_v10 = vmul.f32 %v557_v8, %v1630_v44  ;;  %v574_v13 = vpack.c.bf16 %v572_v1, %v571_v12 }
 0x3f9   :  { %v573_v11 = vpack.c.bf16 %v570_v10, %v569_v9 }
 0x3fb   :  { %710 = vmatmul.mubr.bf16.vlgmr.msra.gmra.mxu1 %v573_v11 }
 0x3fc   :  { %717 = vmatprep.mubr.bf16.mxu1 %v519_v56  ;;  %1224 = vmatpush3.bf16.msra.mxu1 %v1332_v58 }
 0x3fd   :  { %1225 = vmatprep.subr.bf16.mxu1 %v1333_v59 }
 0x400   :  { %1226 = vmatpush3.bf16.msra.mxu1 %v1334_v60 }
 0x401   :  { %1227 = vmatprep.subr.bf16.mxu1 %v1335_v61 }
 0x403   :  { %718 = vmatmul.mubr.bf16.gmra.mxu1 %v574_v13 }
 0x404   :  { %1228 = vmatpush3.bf16.msra.mxu1 %v1336_v62 }
 0x405   :  { %1229 = vmatprep.subr.bf16.mxu1 %v1337_v63 }
 0x408   :  { %1230 = vmatpush3.bf16.msra.mxu1 %v1338_v0 }
 0x409   :  { %1231 = vmatprep.subr.bf16.mxu1 %v1339_v3 }
 0x40c   :  { %1232 = vmatpush3.bf16.msra.mxu1 %v1340_v4 }
 0x40d   :  { %1233 = vmatprep.subr.bf16.mxu1 %v1341_v5 }
 0x4bb   :  { %v1207_v14 = vpop.f32.mrf.mxu1 }
 0x4bd   :  { %v1208_v15 = vpop.f32.mrf.mxu1 }
 0x4be   :  { %v1209_v18 = vadd.f32 %v1208_v15, %v1207_v14 }
 0x4bf   :  { %v1210_v16 = vpop.f32.mrf.mxu1 }
 0x4c0   :  { %v712_v24 = vadd.f32 %v1209_v18, %v1115_v20 }
 0x4c1   :  { %v1211_v17 = vpop.f32.mrf.mxu1 }
 0x4c2   :  { %v1212_v19 = vadd.f32 %v1211_v17, %v1210_v16  ;;  %v726_v30 = vmax.f32 %v712_v24, 0.0  ;;  %v1343_v24 = vld [vmem:[#allocation10 + $0x48] sm:$0xff]  }
 0x4c3   :  { %v1213_v21 = vpop.f32.mrf.mxu1 }
 0x4c4   :  { %v715_v22 = vadd.f32 %v1212_v19, %v1115_v20 }
 0x4c5   :  { %v1214_v23 = vpop.f32.mrf.mxu1 }
 0x4c6   :  { %v1215_v25 = vadd.f32 %v1214_v23, %v1213_v21  ;;  %v727_v27 = vmax.f32 %v715_v22, 0.0  ;;  %v1342_v23 = vld [vmem:[#allocation10 + $0x10] sm:$0xff]  }
 0x4c7   :  { %v1216_v26 = vpop.f32.mrf.mxu1  ;;  %1234 = vmatpush3.bf16.msra.mxu1 %v1342_v23 }
 0x4c8   :  { %v720_v28 = vadd.f32 %v1215_v25, %v1115_v20  ;;  %v730_v33 = vadd.f32 %v727_v27, %v726_v30  ;;  %v1344_v25 = vld [vmem:[#allocation10 + $0x8] sm:$0xff]   ;;  %1235 = vmatprep.subr.bf16.mxu1 %v1343_v24 }
 0x4c9   :  { %v1217_v29 = vpop.f32.mrf.mxu1 }
 0x4ca   :  { %v728_v31 = vmax.f32 %v720_v28, 0.0  ;;  %v1218_v32 = vadd.f32 %v1217_v29, %v1216_v26  ;;  %v1345_v26 = vld [vmem:[#allocation10 + $0x40] sm:$0xff]  }
 0x4cb   :  { %1236 = vmatpush3.bf16.msra.mxu1 %v1344_v25 }
 0x4cc   :  { %v723_v34 = vadd.f32 %v1218_v32, %v1115_v20  ;;  %v731_v35 = vadd.f32 %v730_v33, %v728_v31  ;;  %1237 = vmatprep.subr.bf16.mxu1 %v1345_v26 }
 0x4ce   :  { %v729_v36 = vmax.f32 %v723_v34, 0.0 }
 0x4d0   :  { %v732_v37 = vadd.f32 %v731_v35, %v729_v36 }
 0x4d2   :  { %v733_v38 = vrot.slane %v732_v37, 4 }
 0x4d4   :  { %v734_v39 = vadd.f32 %v733_v38, %v732_v37 }
 0x4d6   :  { %v735_v40 = vrot.slane %v734_v39, 2 }
 0x4d8   :  { %v736_v43 = vadd.f32 %v735_v40, %v734_v39 }
 0x4da   :  { %v737_v45 = vrot.slane %v736_v43, 1 }
 0x4dc   :  { %v738_v46 = vadd.f32 %v737_v45, %v736_v43 }
 0x4de   :  { %v739_v47 = vmul.f32 0.03125, %v738_v46 }
 0x4e0   :  { %v743_v49 = vsub.f32 %v729_v36, %v739_v47  ;;  %v742_v50 = vsub.f32 %v728_v31, %v739_v47  ;;  %v741_v53 = vsub.f32 %v727_v27, %v739_v47  ;;  %v740_v54 = vsub.f32 %v726_v30, %v739_v47  ;;  %v1346_v27 = vld [vmem:[#allocation10] sm:$0xff]  }
 0x4e1   :  { %1238 = vmatpush3.bf16.msra.mxu1 %v1346_v27 }
 0x4e2   :  { %v747_v51 = vmul.f32 %v743_v49, %v743_v49  ;;  %v746_v52 = vmul.f32 %v742_v50, %v742_v50  ;;  %v745_v55 = vmul.f32 %v741_v53, %v741_v53  ;;  %v744_v56 = vmul.f32 %v740_v54, %v740_v54 }
 0x4e4   :  { %754 = vadd.xlane.f32.xlu0 %v747_v51  ;;  %752 = vadd.xlane.f32.xlu1 %v746_v52 }
 0x4e8   :  { %750 = vadd.xlane.f32.xlu0 %v745_v55  ;;  %748 = vadd.xlane.f32.xlu1 %v744_v56 }
 0x56d   :  { %v755_v6 = vpop.xlane.xlu0 %754  ;;  %v753_v7 = vpop.xlane.xlu1 %752 }
 0x56e   :  { %v759_v8 = vadd.f32 1e-06, %v755_v6  ;;  %v758_v9 = vadd.f32 1e-06, %v753_v7 }
 0x570   :  { %1363 = vrsqrt.f32 %v759_v8 }
 0x571   :  { %1365 = vrsqrt.f32 %v758_v9  ;;  %v751_v10 = vpop.xlane.xlu0 %750  ;;  %v749_v11 = vpop.xlane.xlu1 %748 }
 0x572   :  { %v757_v1 = vadd.f32 1e-06, %v751_v10  ;;  %v756_v12 = vadd.f32 1e-06, %v749_v11 }
 0x574   :  { %1367 = vrsqrt.f32 %v757_v1 }
 0x575   :  { %1369 = vrsqrt.f32 %v756_v12 }
 0x57d   :  { %v1364_v13 = vpop.eup %1363 }
 0x57e   :  { %v1366_v14 = vpop.eup %1365  ;;  %v767_v15 = vmul.f32 %v1364_v13, %v743_v49 }
 0x57f   :  { %v766_v16 = vmul.f32 %v1366_v14, %v742_v50 }
 0x581   :  { %v1368_v17 = vpop.eup %1367  ;;  %v802_v18 = vpack.c.bf16 %v767_v15, %v766_v16 }
 0x582   :  { %v1370_v19 = vpop.eup %1369  ;;  %v765_v20 = vmul.f32 %v1368_v17, %v741_v53 }
 0x583   :  { %1275 = vmatprep.subr.bf16.mxu0 %v802_v18  ;;  %v764_v21 = vmul.f32 %v1370_v19, %v740_v54 }
 0x584   :  { %1276 = vmatpush3.bf16.msra.mxu0 %v802_v18 }
 0x585   :  { %v801_v22 = vpack.c.bf16 %v765_v20, %v764_v21 }
 0x587   :  { %1277 = vmatprep.subr.bf16.mxu0 %v801_v22  ;;  %992 = vmatprep.mubr.bf16.mxu1 %v801_v22 }
 0x588   :  { %1278 = vmatpush3.bf16.msra.mxu0 %v801_v22 }
 0x58b   :  { %1280 = vmatmul.mubr.msk.bf16.vlgmr.msra.gmra.mxu0 %vm114_vm0, %v1612_v2 }
 0x64b   :  { %v1281_v28 = vpop.f32.mrf.mxu0 }
 0x64c   :  { %v854_v35 = vmul.f32 %v1281_v28, %v1628_v42 }
 0x64d   :  { %v837_v29 = vpop.f32.mrf.mxu0 }
 0x64e   :  { %v852_v32 = vmul.f32 %v837_v29, %v1626_v41  ;;  %v1134_v41 = vld [vmem:[%s1677_s7] ss:$0 sm:$0xff]  ;;  %s1534_s7 = smov [#allocation11]  }
 0x64f   :  { %v1282_v30 = vpop.f32.mrf.mxu0  ;;  %s1076_s11 = sshll.u32 %s1534_s7, 4  ;;  %s1077_s11 = int_to_ptr.vmem [resolvable:$true] %s1076_s11 }
 0x650   :  { %v855_v2 = vmul.f32 %v1282_v30, %v1634_v48  ;;  %s1495_s12 = scalar_lea.vmem %s1077_s11, 512  ;;  %p1500_p12 = scmp.lt.s32.totalorder %s1077_s11, %s1077_s11 }
 0x651   :  { %v840_v31 = vpop.f32.mrf.mxu0  ;;  %p1496_p11 = scmp.ne.s32.totalorder %s1077_s11, %s1495_s12  ;;  %p1501_p13 = scmp.lt.s32.totalorder %s1495_s12, %s1495_s12 }
 0x652   :  { %v853_v33 = vmul.f32 %v840_v31, %v1630_v44  ;;  %v857_v36 = vpack.c.bf16 %v855_v2, %v854_v35 }
 0x653   :  { %p1502_p0 = por %p1501_p13, %p1500_p12 }
 0x654   :  { %v856_v34 = vpack.c.bf16 %v853_v33, %v852_v32 }
 0x655   :  { %p1503_p1 = pnand %p1502_p0, %p1496_p11 }
 0x656   :  { %993 = vmatmul.mubr.bf16.vlgmr.msra.gmra.mxu1 %v856_v34 }
 0x657   :  { %1000 = vmatprep.mubr.bf16.mxu1 %v802_v18 }
 0x65e   :  { %1001 = vmatmul.mubr.bf16.gmra.mxu1 %v857_v36 }
 0x716   :  { %v1239_v37 = vpop.f32.mrf.mxu1 }
 0x718   :  { %v1240_v38 = vpop.f32.mrf.mxu1 }
 0x719   :  { %v1241_v46 = vadd.f32 %v1240_v38, %v1239_v37 }
 0x71a   :  { %v1242_v39 = vpop.f32.mrf.mxu1 }
 0x71b   :  { %v995_v48 = vadd.f32 %v1241_v46, %v1134_v41 }
 0x71c   :  { %v1243_v40 = vpop.f32.mrf.mxu1 }
 0x71d   :  { %v1244_v43 = vadd.f32 %v1243_v40, %v1242_v39 }
 0x71e   :  { %v1245_v45 = vpop.f32.mrf.mxu1 }
 0x71f   :  { %v998_v47 = vadd.f32 %v1244_v43, %v1134_v41 }
 0x720   :  { %v1246_v44 = vpop.f32.mrf.mxu1 }
 0x721   :  { %v1247_v49 = vadd.f32 %v1246_v44, %v1245_v45  ;;  %v1009_v52 = vadd.f32 %v998_v47, %v995_v48 }
 0x722   :  { %v1248_v50 = vpop.f32.mrf.mxu1 }
 0x723   :  { %v1003_v51 = vadd.f32 %v1247_v49, %v1134_v41 }
 0x724   :  { %v1249_v42 = vpop.f32.mrf.mxu1 }
 0x725   :  { %v1250_v53 = vadd.f32 %v1249_v42, %v1248_v50  ;;  %v1010_v54 = vadd.f32 %v1009_v52, %v1003_v51 }
 0x727   :  { %v1006_v55 = vadd.f32 %v1250_v53, %v1134_v41 }
 0x729   :  { %v1011_v56 = vadd.f32 %v1010_v54, %v1006_v55 }
 0x72b   :  { %v1012_v57 = vrot.slane %v1011_v56, 4 }
 0x72d   :  { %v1013_v58 = vadd.f32 %v1012_v57, %v1011_v56 }
 0x72f   :  { %v1014_v59 = vrot.slane %v1013_v58, 2 }
 0x731   :  { %v1015_v60 = vadd.f32 %v1014_v59, %v1013_v58 }
 0x733   :  { %v1016_v61 = vrot.slane %v1015_v60, 1 }
 0x735   :  { %v1017_v62 = vadd.f32 %v1016_v61, %v1015_v60 }
 0x737   :  { %v1018_v63 = vmul.f32 0.03125, %v1017_v62 }
 0x739   :  { %v1020_v0 = vsub.f32 %v998_v47, %v1018_v63  ;;  %v1019_v3 = vsub.f32 %v995_v48, %v1018_v63  ;;  %v1022_v6 = vsub.f32 %v1006_v55, %v1018_v63  ;;  %v1021_v7 = vsub.f32 %v1003_v51, %v1018_v63 }
 0x73b   :  { %v1024_v4 = vmul.f32 %v1020_v0, %v1020_v0  ;;  %v1023_v5 = vmul.f32 %v1019_v3, %v1019_v3  ;;  %v1026_v8 = vmul.f32 %v1022_v6, %v1022_v6  ;;  %v1025_v9 = vmul.f32 %v1021_v7, %v1021_v7 }
 0x73d   :  { %1029 = vadd.xlane.f32.xlu0 %v1024_v4  ;;  %1027 = vadd.xlane.f32.xlu1 %v1023_v5 }
 0x741   :  { %1033 = vadd.xlane.f32.xlu0 %v1026_v8  ;;  %1031 = vadd.xlane.f32.xlu1 %v1025_v9 }
 0x7c6   :  { %v1030_v10 = vpop.xlane.xlu0 %1029  ;;  %v1028_v11 = vpop.xlane.xlu1 %1027 }
 0x7c7   :  { %v1036_v1 = vadd.f32 1e-06, %v1030_v10  ;;  %v1035_v12 = vadd.f32 1e-06, %v1028_v11 }
 0x7c9   :  { %1371 = vrsqrt.f32 %v1036_v1 }
 0x7ca   :  { %1373 = vrsqrt.f32 %v1035_v12  ;;  %v1034_v13 = vpop.xlane.xlu0 %1033  ;;  %v1032_v14 = vpop.xlane.xlu1 %1031 }
 0x7cb   :  { %v1038_v15 = vadd.f32 1e-06, %v1034_v13  ;;  %v1037_v16 = vadd.f32 1e-06, %v1032_v14 }
 0x7cd   :  { %1375 = vrsqrt.f32 %v1038_v15 }
 0x7ce   :  { %1377 = vrsqrt.f32 %v1037_v16 }
 0x7d6   :  { %v1372_v17 = vpop.eup %1371 }
 0x7d7   :  { %v1374_v18 = vpop.eup %1373  ;;  %v1044_v19 = vmul.f32 %v1372_v17, %v1020_v0 }
 0x7d8   :  { %v1043_v20 = vmul.f32 %v1374_v18, %v1019_v3 }
 0x7d9   :  { %v1048_v21 = vsub.f32 0.0, %v1044_v19 }
 0x7da   :  { %v1376_v22 = vpop.eup %1375  ;;  %v1047_v23 = vsub.f32 0.0, %v1043_v20 }
 0x7db   :  { %v1378_v24 = vpop.eup %1377  ;;  %v1053_v25 = vmul.f32 1.442695, %v1048_v21  ;;  %v1046_v26 = vmul.f32 %v1376_v22, %v1022_v6 }
 0x7dc   :  { %v1051_v27 = vmul.f32 1.442695, %v1047_v23  ;;  %v1045_v28 = vmul.f32 %v1378_v24, %v1021_v7 }
 0x7dd   :  { %1379 = vpow2.f32 %v1053_v25  ;;  %v1050_v29 = vsub.f32 0.0, %v1046_v26 }
 0x7de   :  { %1381 = vpow2.f32 %v1051_v27  ;;  %v1049_v30 = vsub.f32 0.0, %v1045_v28 }
 0x7df   :  { %v1057_v31 = vmul.f32 1.442695, %v1050_v29 }
 0x7e0   :  { %v1055_v32 = vmul.f32 1.442695, %v1049_v30 }
 0x7e1   :  { %1383 = vpow2.f32 %v1057_v31 }
 0x7e2   :  { %1385 = vpow2.f32 %v1055_v32 }
 0x7ea   :  { %v1380_v33 = vpop.eup %1379 }
 0x7eb   :  { %v1382_v34 = vpop.eup %1381  ;;  %v1060_v2 = vadd.f32 1.0, %v1380_v33 }
 0x7ec   :  { %v1059_v35 = vadd.f32 1.0, %v1382_v34 }
 0x7ed   :  { %1387 = vrcp.f32 %v1060_v2 }
 0x7ee   :  { %v1384_v36 = vpop.eup %1383  ;;  %1389 = vrcp.f32 %v1059_v35 }
 0x7ef   :  { %v1386_v37 = vpop.eup %1385  ;;  %v1062_v38 = vadd.f32 1.0, %v1384_v36 }
 0x7f0   :  { %v1061_v39 = vadd.f32 1.0, %v1386_v37 }
 0x7f1   :  { %1391 = vrcp.f32 %v1062_v38 }
 0x7f2   :  { %1393 = vrcp.f32 %v1061_v39 }
 0x7fa   :  { %v1388_v40 = vpop.eup %1387 }
 0x7fb   :  { %v1390_v43 = vpop.eup %1389  ;;  %1068 = vst [vmem:[#allocation11 + $0x8] sm:$0xff] %v1388_v40 }
 0x7fc   :  { %1067 = vst [vmem:[#allocation11] sm:$0xff] %v1390_v43 }
 0x7fe   :  { %v1392_v45 = vpop.eup %1391 }
 0x7ff   :  { %v1394_v46 = vpop.eup %1393  ;;  %1070 = vst [vmem:[#allocation11 + $0x18] sm:$0xff] %v1392_v45 }
 0x800   :  { %1069 = vst [vmem:[#allocation11 + $0x10] sm:$0xff] %v1394_v46 }
 0x801   :  { %1506 = shalt.err (!%p1503_p1)
}
 0x802   :  { %1082 = dma.vmem_to_hbm [thread:$0]  %s1077_s11, 512, %s1678_s8, [#allocation4], %s1528_s19, %s1528_s19, %s1529_s20  }
 0x803   :  { %1521 = dma.done.wait [#allocation4], 512  }
 0x804   :  { %1522 = vsyncadd [#allocation4], 4294966784 }
 0x805   :  { %1086 = vsyncpa [#allocation3], 1 }
 0x806   :  { %1087 = vsyncpa [#allocation6], 1 }
 0x807   :  { %1088 = vsyncpa [#allocation9], 1 }
 0x808   :  { %1089 = vsyncpa [#allocation4], 1 }

</bundles_post_ra>
